<compile_context>
chip_gen: v7x
topology: tpu7x:2x2x1
jax: 0.10.0
libtpu: 0.0.40
codegen_flags: <defaults>
</compile_context>

<pallas_src>
import functools

import jax
import jax.numpy as jnp
from jax.experimental import pallas as pl
from jax.experimental.pallas import tpu as pltpu


def _round_up(x: int, m: int) -> int:
    return ((x + m - 1) // m) * m


def _ce_loss_kernel(logits_ref, tgt_logit_ref, loss_ref, m_sc, l_sc, *,
                    num_valid_rows: int):
    """One (TB, CC) tile of a streaming cross-entropy.

    logits_ref:    [TB, CC] (native dtype)
    tgt_logit_ref: [TB, 1]  f32 (logit of the target class, precomputed in wrapper)
    loss_ref:      [TB, 1]  f32 per-row loss (written at the last class chunk)
    scratch:       m_sc / l_sc, each [TB, 1] f32
    """
    i = pl.program_id(0)          # batch-tile index (parallel)
    j = pl.program_id(1)          # class-chunk index (reduction axis)

    @pl.when(j == 0)
    def _():
        m_sc[...] = jnp.full_like(m_sc, -jnp.inf)
        l_sc[...] = jnp.zeros_like(l_sc)

    x = logits_ref[...]            # [TB, CC] — native dtype; f32 cast fused into exp

    # ---- online (streaming) log-sum-exp ------------------------------------
    chunk_max = jnp.max(x, axis=-1, keepdims=True).astype(jnp.float32)   # [TB,1]
    m_new = jnp.maximum(m_sc[...], chunk_max)                            # [TB,1]
    p_sum = jnp.sum(jnp.exp(x.astype(jnp.float32) - m_new),
                    axis=-1, keepdims=True)                              # [TB,1]
    l_sc[...] = jnp.exp(m_sc[...] - m_new) * l_sc[...] + p_sum
    m_sc[...] = m_new

    # ---- finalize: one log per row, mask padded rows, emit per-row loss ----
    @pl.when(j == pl.num_programs(1) - 1)
    def _():
        tb = loss_ref.shape[0]
        lse = m_sc[...] + jnp.log(l_sc[...])                             # [TB,1]
        per_sample = lse - tgt_logit_ref[...]                            # -log_softmax[target]
        row_ids = jax.lax.broadcasted_iota(jnp.int32, (tb, 1), 0) + i * tb
        loss_ref[...] = jnp.where(row_ids < num_valid_rows, per_sample, 0.0)


def cross_entropy_loss(logits: jax.Array, targets: jax.Array, *,
                       tile_b: int = 512, tile_c: int | None = None) -> jax.Array:
    """logits: [B, C] float, targets: [B] int — scalar mean CE loss (float32).

    Matches torch.nn.CrossEntropyLoss() defaults (mean reduction, class-index
    targets, no ignore_index / label smoothing / class weights).
    """
    b, c = logits.shape
    itemsize = jnp.dtype(logits.dtype).itemsize

    # Native sublane packing: 8 rows for 32-bit, 16 for bf16, 32 for int8/fp8.
    sublane = max(8, 32 // itemsize)
    lane = 128

    # Default class chunk: ~8 MiB per buffer regardless of dtype.
    if tile_c is None:
        tile_c = 8192 if itemsize < 4 else 4096

    # Clamp user-supplied tile sizes to legal (sublane, 128) multiples.
    tile_b = _round_up(max(tile_b, sublane), sublane)
    tile_c = _round_up(max(tile_c, lane), lane)

    # Tile sizes: shrink to the (padded) problem if smaller than the tile.
    tb = min(tile_b, _round_up(b, sublane))
    cc = min(tile_c, _round_up(c, lane))

    # Ensure >= 2 batch tiles whenever the batch permits, so the "parallel" batch
    # axis can shard across both v7x TensorCores (cheap on single-TC chips).
    if b > sublane and _round_up(b, tb) // tb < 2:
        tb = _round_up(pl.cdiv(b, 2), sublane)

    bp = _round_up(b, tb)
    cp = _round_up(c, cc)
    grid = (bp // tb, cp // cc)

    # Column/row padding with the dtype's most-negative finite value: it never wins
    # the running max for real rows and its exp underflows to 0 (no inf-inf NaN).
    # Padded rows are masked to 0 inside the kernel via `num_valid_rows`.
    pad_val = float(jnp.finfo(logits.dtype).min)
    logits_p = jnp.pad(logits, ((0, bp - b), (0, cp - c)), constant_values=pad_val)

    # O(B) target-logit gather done once in the wrapper (review item 1): removes the
    # per-tile iota/compare/select/reduce pass from the kernel entirely.
    tgt_logit = jnp.take_along_axis(
        logits, targets.reshape(b, 1).astype(jnp.int32), axis=-1).astype(jnp.float32)
    tgt_logit_p = jnp.pad(tgt_logit, ((0, bp - b), (0, 0)))

    # `num_valid_rows` is baked in; b is already a static shape in JAX so every
    # distinct batch size recompiles anyway — no extra recompiles are introduced.
    kernel = functools.partial(_ce_loss_kernel, num_valid_rows=b)

    # VMEM budget: double-buffered logits tiles dominate; add headroom for Mosaic
    # internal scratch. Stays well under v7x's 64 MiB per-TC VMEM at default tiles.
    tile_bytes = tb * cc * itemsize
    vmem_limit_bytes = max(16 << 20, 2 * tile_bytes + (8 << 20))

    cost = pl.CostEstimate(
        flops=4 * bp * cp + 6 * bp,
        transcendentals=bp * cp + 2 * bp * grid[1] + bp,   # exp/elem + rescale exps + log/row
        bytes_accessed=bp * cp * itemsize + bp * 4 + bp * 4,
    )

    per_row = pl.pallas_call(
        kernel,
        out_shape=jax.ShapeDtypeStruct((bp, 1), jnp.float32),
        grid_spec=pltpu.PrefetchScalarGridSpec(
            num_scalar_prefetch=0,
            grid=grid,
            in_specs=[
                pl.BlockSpec((tb, cc), lambda i, j: (i, j)),   # logits tile
                pl.BlockSpec((tb, 1), lambda i, j: (i, 0)),    # target logit per row
            ],
            out_specs=pl.BlockSpec((tb, 1), lambda i, j: (i, 0)),
            scratch_shapes=[
                pltpu.VMEM((tb, 1), jnp.float32),   # running max m
                pltpu.VMEM((tb, 1), jnp.float32),   # running sum l
            ],
        ),
        compiler_params=pltpu.CompilerParams(
            dimension_semantics=("parallel", "arbitrary"),
            vmem_limit_bytes=vmem_limit_bytes,
        ),
        cost_estimate=cost,
    )(logits_p, tgt_logit_p)

    # Tiny final reduction in f32 (padded rows were zeroed in-kernel).
    return jnp.sum(per_row) / jnp.float32(b)


def _reference_ce(logits, targets):
    logits = logits.astype(jnp.float32)
    lse = jax.scipy.special.logsumexp(logits, axis=-1)
    tgt = jnp.take_along_axis(logits, targets[:, None].astype(jnp.int32), axis=-1)[:, 0]
    return jnp.mean(lse - tgt)


# TODO(synk): nn.CrossEntropyLoss options (ignore_index, label_smoothing, class
# weights, 'sum'/'none' reductions) are not implemented — only the default
# configuration used by the module.

if __name__ == "__main__":
    key = jax.random.PRNGKey(0)
    k1, k2, k3, k4, k5, k6 = jax.random.split(key, 6)

    # Small shape matching the module's forward: pred [B, C], gt [B].
    B, C = 8, 32
    logits = jax.random.normal(k1, (B, C), dtype=jnp.float32)
    targets = jax.random.randint(k2, (B,), 0, C, dtype=jnp.int32)

    loss = jax.block_until_ready(cross_entropy_loss(logits, targets))
    ref = _reference_ce(logits, targets)
    assert jnp.allclose(loss, ref, atol=1e-5, rtol=1e-5), (loss, ref)

    # Exercise the tiled / streaming path (multi-tile grid + row/column padding).
    B2, C2 = 20, 300
    logits2 = jax.random.normal(k3, (B2, C2), dtype=jnp.float32)
    targets2 = jax.random.randint(k4, (B2,), 0, C2, dtype=jnp.int32)
    loss2 = jax.block_until_ready(
        cross_entropy_loss(logits2, targets2, tile_b=8, tile_c=128))
    ref2 = _reference_ce(logits2, targets2)
    assert jnp.allclose(loss2, ref2, atol=1e-5, rtol=1e-5), (loss2, ref2)

    # bf16 logits + the ">= 2 batch tiles" path.
    B3, C3 = 48, 1024
    logits3 = jax.random.normal(k5, (B3, C3), dtype=jnp.bfloat16)
    targets3 = jax.random.randint(k6, (B3,), 0, C3, dtype=jnp.int32)
    loss3 = jax.block_until_ready(cross_entropy_loss(logits3, targets3))
    ref3 = _reference_ce(logits3, targets3)
    assert jnp.allclose(loss3, ref3, atol=2e-2, rtol=2e-2), (loss3, ref3)

    print("KERNEL_OK")
</pallas_src>

<mosaic_0001>
module attributes {stable_mosaic.version = 11 : i64} {
  func.func @_ce_loss_kernel(%arg0: i32, %arg1: i32, %arg2: memref<8x128xf32, #tpu.memory_space<vmem>>, %arg3: memref<8x1xf32, #tpu.memory_space<vmem>>, %arg4: memref<8x1xf32, #tpu.memory_space<vmem>>, %arg5: memref<8x1xf32, #tpu.memory_space<vmem>>, %arg6: memref<8x1xf32, #tpu.memory_space<vmem>>) attributes {dimension_semantics = [#tpu.dimension_semantics<parallel>, #tpu.dimension_semantics<arbitrary>], iteration_bounds = array<i64: 1, 1>, scalar_prefetch = 0 : i64, scratch_operands = 2 : i64, tpu.core_type = #tpu.core_type<tc>, window_params = [{transform_indices = @transform_0, window_bounds = array<i64: 8, 128>}, {transform_indices = @transform_1, window_bounds = array<i64: 8, 1>}, {transform_indices = @transform_2, window_bounds = array<i64: 8, 1>}]} {
    %c0_i32 = arith.constant 0 : i32
    %0 = arith.cmpi eq, %arg1, %c0_i32 : i32
    %1 = arith.extui %0 : i1 to i32
    %c0_i32_0 = arith.constant 0 : i32
    %2 = arith.cmpi ne, %1, %c0_i32_0 : i32
    scf.if %2 {
      %cst_15 = arith.constant 0xFF800000 : f32
      %24 = vector.broadcast %cst_15 : f32 to vector<8x1xf32>
      %c0_16 = arith.constant 0 : index
      %c0_17 = arith.constant 0 : index
      %25 = vector.load %arg5[%c0_16, %c0_17] : memref<8x1xf32, #tpu.memory_space<vmem>>, vector<8x1xf32>
      tpu.vector_store %arg5[%c0_16, %c0_17], %24 {strides = array<i32>} : memref<8x1xf32, #tpu.memory_space<vmem>>, vector<8x1xf32>,
      %cst_18 = arith.constant 0.000000e+00 : f32
      %26 = vector.broadcast %cst_18 : f32 to vector<8x1xf32>
      %c0_19 = arith.constant 0 : index
      %c0_20 = arith.constant 0 : index
      %27 = vector.load %arg6[%c0_19, %c0_20] : memref<8x1xf32, #tpu.memory_space<vmem>>, vector<8x1xf32>
      tpu.vector_store %arg6[%c0_19, %c0_20], %26 {strides = array<i32>} : memref<8x1xf32, #tpu.memory_space<vmem>>, vector<8x1xf32>,
    } else {
    }
    %c0 = arith.constant 0 : index
    %c0_1 = arith.constant 0 : index
    %3 = vector.load %arg2[%c0, %c0_1] : memref<8x128xf32, #tpu.memory_space<vmem>>, vector<8x128xf32>
    %cst = arith.constant dense<0xFF800000> : vector<8xf32>
    %4 = vector.multi_reduction <maximumf>, %3, %cst [1] : vector<8x128xf32> to vector<8xf32>
    %5 = vector.shape_cast %4 : vector<8xf32> to vector<8x1xf32>
    %c0_2 = arith.constant 0 : index
    %c0_3 = arith.constant 0 : index
    %6 = vector.load %arg5[%c0_2, %c0_3] : memref<8x1xf32, #tpu.memory_space<vmem>>, vector<8x1xf32>
    %7 = arith.maximumf %6, %5 : vector<8x1xf32>
    %8 = vector.broadcast %7 : vector<8x1xf32> to vector<8x128xf32>
    %9 = arith.subf %3, %8 : vector<8x128xf32>
    %10 = math.exp %9 : vector<8x128xf32>
    %cst_4 = arith.constant dense<0.000000e+00> : vector<8xf32>
    %11 = vector.multi_reduction <add>, %10, %cst_4 [1] : vector<8x128xf32> to vector<8xf32>
    %12 = vector.shape_cast %11 : vector<8xf32> to vector<8x1xf32>
    %c0_5 = arith.constant 0 : index
    %c0_6 = arith.constant 0 : index
    %13 = vector.load %arg5[%c0_5, %c0_6] : memref<8x1xf32, #tpu.memory_space<vmem>>, vector<8x1xf32>
    %14 = arith.subf %13, %7 : vector<8x1xf32>
    %15 = math.exp %14 : vector<8x1xf32>
    %c0_7 = arith.constant 0 : index
    %c0_8 = arith.constant 0 : index
    %16 = vector.load %arg6[%c0_7, %c0_8] : memref<8x1xf32, #tpu.memory_space<vmem>>, vector<8x1xf32>
    %17 = arith.mulf %15, %16 : vector<8x1xf32>
    %18 = arith.addf %17, %12 : vector<8x1xf32>
    %c0_9 = arith.constant 0 : index
    %c0_10 = arith.constant 0 : index
    %19 = vector.load %arg6[%c0_9, %c0_10] : memref<8x1xf32, #tpu.memory_space<vmem>>, vector<8x1xf32>
    tpu.vector_store %arg6[%c0_9, %c0_10], %18 {strides = array<i32>} : memref<8x1xf32, #tpu.memory_space<vmem>>, vector<8x1xf32>,
    %c0_11 = arith.constant 0 : index
    %c0_12 = arith.constant 0 : index
    %20 = vector.load %arg5[%c0_11, %c0_12] : memref<8x1xf32, #tpu.memory_space<vmem>>, vector<8x1xf32>
    tpu.vector_store %arg5[%c0_11, %c0_12], %7 {strides = array<i32>} : memref<8x1xf32, #tpu.memory_space<vmem>>, vector<8x1xf32>,
    %c0_i32_13 = arith.constant 0 : i32
    %21 = arith.cmpi eq, %arg1, %c0_i32_13 : i32
    %22 = arith.extui %21 : i1 to i32
    %c0_i32_14 = arith.constant 0 : i32
    %23 = arith.cmpi ne, %22, %c0_i32_14 : i32
    scf.if %23 {
      %c0_15 = arith.constant 0 : index
      %c0_16 = arith.constant 0 : index
      %24 = vector.load %arg5[%c0_15, %c0_16] : memref<8x1xf32, #tpu.memory_space<vmem>>, vector<8x1xf32>
      %c0_17 = arith.constant 0 : index
      %c0_18 = arith.constant 0 : index
      %25 = vector.load %arg6[%c0_17, %c0_18] : memref<8x1xf32, #tpu.memory_space<vmem>>, vector<8x1xf32>
      %26 = math.log %25 : vector<8x1xf32>
      %27 = arith.addf %24, %26 : vector<8x1xf32>
      %c0_19 = arith.constant 0 : index
      %c0_20 = arith.constant 0 : index
      %28 = vector.load %arg3[%c0_19, %c0_20] : memref<8x1xf32, #tpu.memory_space<vmem>>, vector<8x1xf32>
      %29 = arith.subf %27, %28 : vector<8x1xf32>
      %30 = tpu.iota {dimensions = array<i32: 0>} : vector<8x1xi32>
      %c8_i32 = arith.constant 8 : i32
      %31 = arith.muli %arg0, %c8_i32 : i32
      %32 = vector.broadcast %31 : i32 to vector<8x1xi32>
      %33 = arith.addi %30, %32 : vector<8x1xi32>
      %c8_i32_21 = arith.constant 8 : i32
      %34 = vector.broadcast %c8_i32_21 : i32 to vector<8x1xi32>
      %35 = arith.cmpi slt, %33, %34 : vector<8x1xi32>
      %cst_22 = arith.constant 0.000000e+00 : f32
      %36 = vector.broadcast %cst_22 : f32 to vector<8x1xf32>
      %37 = arith.select %35, %29, %36 : vector<8x1xi1>, vector<8x1xf32>
      %c0_23 = arith.constant 0 : index
      %c0_24 = arith.constant 0 : index
      %38 = vector.load %arg4[%c0_23, %c0_24] : memref<8x1xf32, #tpu.memory_space<vmem>>, vector<8x1xf32>
      tpu.vector_store %arg4[%c0_23, %c0_24], %37 {strides = array<i32>} : memref<8x1xf32, #tpu.memory_space<vmem>>, vector<8x1xf32>,
    } else {
    }
    return
  }
  func.func @transform_0(%arg0: i32, %arg1: i32) -> (i32, i32) {
    %c0_i32 = arith.constant 0 : i32
    return %arg0, %arg1 : i32, i32
  }
  func.func @transform_1(%arg0: i32, %arg1: i32) -> (i32, i32) {
    %c0_i32 = arith.constant 0 : i32
    %c0_i32_0 = arith.constant 0 : i32
    return %arg0, %c0_i32 : i32, i32
  }
  func.func @transform_2(%arg0: i32, %arg1: i32) -> (i32, i32) {
    %c0_i32 = arith.constant 0 : i32
    %c0_i32_0 = arith.constant 0 : i32
    return %arg0, %c0_i32 : i32, i32
  }
}

</mosaic_0001>

<bundles_post_ra>
// kernel: tpu_custom_call.1
= control target key start
LH: loop header
LB: loop body
LE: loop exit
PB: predicated region body
PF: predicated region fallthrough
CT: control target
= control target key end

     0   :  { %vm15_vm0 = vcmask 7168   ;;  %v74_v1 = vmov -inf   ;;  %v75_v2 = vmov 0   ;;  %v76_v3 = vmov 0.0   ;;  %s106_s0 = inlined_call_operand.vmem [shape: f32[8,128], index: 0, kind: input, shape index: {}]   ;;  %s107_s1 = inlined_call_operand.vmem [shape: f32[8,1], index: 1, kind: input, shape index: {}]   ;;  %s108_s2 = inlined_call_operand.vmem [shape: f32[8,1], index: 2, kind: output, shape index: {}]  }
   0x1   :  { %v18_v0 = vld [vmem:[%s106_s0] sm:$0xff]  ;;  %16 = vst.msk [vmem:[#allocation2] sm:$0xff] %vm15_vm0, %v74_v1  ;;  %67 = vset.pattern.permute.xlu0 %v75_v2  ;;  %17 = vst.msk [vmem:[#allocation3] sm:$0xff] %vm15_vm0, %v76_v3 }
   0x2   :  { %19 = vmax.xlane.f32.xlu0 %v18_v0  ;;  %v50_v22 = vld [vmem:[%s107_s1] sm:$0xff] }
   0x8   :  { %v21_v4 = vld [vmem:[#allocation2] sm:$0xff]  ;;  %v36_v14 = vld [vmem:[#allocation3] sm:$0xff] }
  0x8f   :  { %v20_v5 = vpop.xlane.xlu0 %19 }
  0x90   :  { %v22_v6 = vmax.f32 %v21_v4, %v20_v5 }
  0x92   :  { %v33_v7 = vsub.f32 %v21_v4, %v22_v6  ;;  %41 = vst.msk [vmem:[#allocation2] sm:$0xff] %vm15_vm0, %v22_v6  ;;  %25 = vperm.xlu0 %67, %v22_v6  }
  0x94   :  { %v34_v12 = vmul.f32 1.442695, %v33_v7 }
  0x99   :  { %v45_v21 = vld [vmem:[#allocation2] sm:$0xff] }
 0x111   :  { %v26_v8 = vpop.permute.xlu0 %25 }
 0x112   :  { %v28_v9 = vsub.f32 %v18_v0, %v26_v8 }
 0x114   :  { %v29_v10 = vmul.f32 1.442695, %v28_v9 }
 0x116   :  { %68 = vpow2.f32 %v29_v10 }
 0x117   :  { %70 = vpow2.f32 %v34_v12 }
 0x120   :  { %v69_v11 = vpop.eup %68 }
 0x121   :  { %31 = vadd.xlane.f32.xlu1 %v69_v11  ;;  %v71_v13 = vpop.eup %70 }
 0x122   :  { %v37_v15 = vmul.f32 %v71_v13, %v36_v14 }
 0x1ae   :  { %v32_v16 = vpop.xlane.xlu1 %31 }
 0x1af   :  { %v38_v17 = vadd.f32 %v37_v15, %v32_v16 }
 0x1b1   :  { %40 = vst.msk [vmem:[#allocation3] sm:$0xff] %vm15_vm0, %v38_v17 }
 0x1b8   :  { %v46_v18 = vld [vmem:[#allocation3] sm:$0xff] }
 0x1b9   :  { %72 = vlog2.f32 %v46_v18 }
 0x1c3   :  { %v73_v19 = vpop.eup %72 }
 0x1c4   :  { %v48_v20 = vmul.f32 0.6931472, %v73_v19 }
 0x1c6   :  { %v49_v23 = vadd.f32 %v48_v20, %v45_v21 }
 0x1c8   :  { %v51_v24 = vsub.f32 %v49_v23, %v50_v22 }
 0x1ca   :  { %59 = vst.msk [vmem:[%s108_s2] sm:$0xff] %vm15_vm0, %v51_v24 }

</bundles_post_ra>
